<compile_context>
chip_gen: v6e
topology: v6e:2x2x1
jax: 0.10.0
libtpu: 0.0.40
codegen_flags: <defaults>
</compile_context>

<pallas_src>
import jax
import jax.numpy as jnp
from jax.experimental import pallas as pl
from jax.experimental.pallas import tpu as pltpu


def _round_up(x, m):
    return (x + m - 1) // m * m


def recon_dnn_kernel(x_ref, w1_ref, b1_ref, w2_ref, b2_ref, o_ref):
    """out = relu(x @ W1 + b1) @ W2 + b2 for one batch tile, fused in VMEM."""
    mm_dtype = w1_ref.dtype
    x = x_ref[...].astype(mm_dtype)
    # Layer 1: Linear(K, H) + ReLU.  f32 accumulation on the MXU, ReLU on VPU.
    h = jnp.dot(x, w1_ref[...], preferred_element_type=jnp.float32) + b1_ref[...]
    h = jnp.maximum(h, 0.0)
    # Layer 2: Linear(H, N).
    out = jnp.dot(h.astype(w2_ref.dtype), w2_ref[...],
                  preferred_element_type=jnp.float32) + b2_ref[...]
    o_ref[...] = out.astype(o_ref.dtype)


def prepare_params(params, matmul_dtype=None):
    """One-time prep (hoisted out of the per-call forward path): transpose the
    PyTorch (out, in) weights to (in, out) and cast to the matmul dtype.
    Biases stay f32 (they add into the f32 accumulator)."""
    mm_dtype = (jnp.dtype(matmul_dtype) if matmul_dtype is not None
                else jnp.dtype(params["w1"].dtype))
    return {
        "w1": jnp.asarray(params["w1"].T, mm_dtype),            # (K, H)
        "b1": jnp.asarray(params["b1"], jnp.float32).reshape(1, -1),
        "w2": jnp.asarray(params["w2"].T, mm_dtype),            # (H, N)
        "b2": jnp.asarray(params["b2"], jnp.float32).reshape(1, -1),
    }


def _choose_tm(batch, tm_max=512):
    """Batch tile: large enough to amortize per-step overhead, small enough
    that the grid has >= 2 steps (v7x megacore sharding + DMA/compute
    overlap), with balanced tiles instead of one full tile + tiny remainder."""
    if batch <= 8:
        return batch                      # single tiny tile (full-extent dim)
    n_tiles = max(2, pl.cdiv(batch, tm_max))
    tm = _round_up(pl.cdiv(batch, n_tiles), 8)
    return min(tm, _round_up(batch, 8))


def recon_dnn_forward(x, prep, *, tm_max=512, out_dtype=None):
    """x: (B, hidden_size).  prep: output of prepare_params()."""
    B, K = x.shape
    Kw, H = prep["w1"].shape
    Hw, N = prep["w2"].shape
    assert K == Kw and H == Hw, (x.shape, prep["w1"].shape, prep["w2"].shape)
    out_dtype = (jnp.dtype(out_dtype) if out_dtype is not None
                 else jnp.dtype(x.dtype))
    mm_bytes = jnp.dtype(prep["w1"].dtype).itemsize
    x_bytes = jnp.dtype(x.dtype).itemsize

    tm = _choose_tm(B, tm_max)
    grid = (pl.cdiv(B, tm),)

    # --- VMEM budget.  Pallas double-buffers every BlockSpec input, including
    # the grid-invariant weights, so count those twice.
    # NOTE: if the weights ever grow so (K*H + H*N) * mm_bytes * 2 exceeds
    # ~50% of VMEM (relevant first on v7x's 64 MiB), switch to an H/N-tiled
    # grid axis with an f32 scratch accumulator instead of resident weights.
    est_bytes = (2 * tm * K * x_bytes                 # x tile (double-buffered)
                 + 2 * tm * N * out_dtype.itemsize    # out tile (double-buffered)
                 + 2 * (K * H + H * N) * mm_bytes     # weights (2 pipeline bufs)
                 + 2 * (H + N) * 4                    # biases  (2 pipeline bufs)
                 + 2 * tm * H * 4)                    # f32 hidden temporaries
    try:
        vmem_cap = pltpu.get_tpu_info().vmem_capacity_bytes
    except Exception:  # pragma: no cover - conservative fallback (v7x per-TC)
        vmem_cap = 64 * 1024 * 1024
    vmem_limit = int(min(max(2 * est_bytes, 32 * 1024 * 1024),
                         int(0.9 * vmem_cap)))

    cost = pl.CostEstimate(
        flops=2 * B * (K * H + H * N),
        transcendentals=0,
        bytes_accessed=(B * K * x_bytes                 # x (read once)
                        + (K * H + H * N) * mm_bytes    # weights
                        + (H + N) * 4                   # biases (f32)
                        + B * N * out_dtype.itemsize),  # output
    )

    return pl.pallas_call(
        recon_dnn_kernel,
        out_shape=jax.ShapeDtypeStruct((B, N), out_dtype),
        grid_spec=pltpu.PrefetchScalarGridSpec(
            num_scalar_prefetch=0,
            grid=grid,
            in_specs=[
                pl.BlockSpec((tm, K), lambda i: (i, 0)),   # x batch tile
                pl.BlockSpec((K, H), lambda i: (0, 0)),    # w1 (VMEM-resident)
                pl.BlockSpec((1, H), lambda i: (0, 0)),    # b1
                pl.BlockSpec((H, N), lambda i: (0, 0)),    # w2 (VMEM-resident)
                pl.BlockSpec((1, N), lambda i: (0, 0)),    # b2
            ],
            out_specs=pl.BlockSpec((tm, N), lambda i: (i, 0)),
        ),
        compiler_params=pltpu.CompilerParams(
            dimension_semantics=("parallel",),
            vmem_limit_bytes=vmem_limit),
        cost_estimate=cost,
    )(x, prep["w1"], prep["b1"], prep["w2"], prep["b2"])


def init_params(key, hidden_size, feature_size, hidden_size2=128):
    """PyTorch nn.Linear default init: U(-1/sqrt(fan_in), 1/sqrt(fan_in))."""
    ks = jax.random.split(key, 4)

    def uniform(k, shape, fan_in):
        bound = 1.0 / jnp.sqrt(fan_in)
        return jax.random.uniform(k, shape, jnp.float32, -bound, bound)

    return {
        "w1": uniform(ks[0], (hidden_size2, hidden_size), hidden_size),
        "b1": uniform(ks[1], (hidden_size2,), hidden_size),
        "w2": uniform(ks[2], (feature_size, hidden_size2), hidden_size2),
        "b2": uniform(ks[3], (feature_size,), hidden_size2),
    }


def reference_forward(x, p):
    """Plain-JAX reference replicating the PyTorch ReconDNN semantics."""
    h = jnp.maximum(x @ p["w1"].T + p["b1"], 0.0)
    return h @ p["w2"].T + p["b2"]


if __name__ == "__main__":
    hidden_size = 32        # input embedding size
    hidden_size2 = 128      # module default
    feature_size = 48       # reconstructed feature size (exercises small N)
    batch = 8

    key = jax.random.PRNGKey(0)
    k_param, k_x = jax.random.split(key)
    params = init_params(k_param, hidden_size, feature_size, hidden_size2)
    x = jax.random.normal(k_x, (batch, hidden_size), jnp.float32)

    ref = reference_forward(x, params)

    # f32 path (default) -- strict tolerance.
    prep32 = prepare_params(params)                 # hoisted, once per params
    out = jax.block_until_ready(recon_dnn_forward(x, prep32))
    assert out.shape == (batch, feature_size), out.shape
    assert jnp.allclose(out, ref, atol=1e-5, rtol=1e-5), \
        f"f32 max abs err {float(jnp.max(jnp.abs(out - ref)))}"

    # bf16 matmul operands, f32 accumulation (fast / low-DMA path on v6e/v7x).
    prep16 = prepare_params(params, matmul_dtype=jnp.bfloat16)
    out16 = jax.block_until_ready(
        recon_dnn_forward(x.astype(jnp.bfloat16), prep16,
                          out_dtype=jnp.float32))
    assert out16.shape == (batch, feature_size), out16.shape
    assert jnp.allclose(out16, ref, atol=5e-2, rtol=5e-2), \
        f"bf16 max abs err {float(jnp.max(jnp.abs(out16 - ref)))}"

    print("KERNEL_OK")
</pallas_src>

<mosaic_0001>
module attributes {stable_mosaic.version = 11 : i64} {
  func.func @recon_dnn_kernel(%arg0: i32, %arg1: memref<8x32xf32, #tpu.memory_space<vmem>>, %arg2: memref<32x128xf32, #tpu.memory_space<vmem>>, %arg3: memref<1x128xf32, #tpu.memory_space<vmem>>, %arg4: memref<128x48xf32, #tpu.memory_space<vmem>>, %arg5: memref<1x48xf32, #tpu.memory_space<vmem>>, %arg6: memref<8x48xf32, #tpu.memory_space<vmem>>) attributes {dimension_semantics = [#tpu.dimension_semantics<parallel>], iteration_bounds = array<i64: 1>, scalar_prefetch = 0 : i64, scratch_operands = 0 : i64, tpu.core_type = #tpu.core_type<tc>, window_params = [{transform_indices = @transform_0, window_bounds = array<i64: 8, 32>}, {pipeline_mode = #tpu.pipeline_mode<synchronous>, transform_indices = @transform_1, window_bounds = array<i64: 32, 128>}, {pipeline_mode = #tpu.pipeline_mode<synchronous>, transform_indices = @transform_2, window_bounds = array<i64: 1, 128>}, {pipeline_mode = #tpu.pipeline_mode<synchronous>, transform_indices = @transform_3, window_bounds = array<i64: 128, 48>}, {pipeline_mode = #tpu.pipeline_mode<synchronous>, transform_indices = @transform_4, window_bounds = array<i64: 1, 48>}, {transform_indices = @transform_5, window_bounds = array<i64: 8, 48>}]} {
    %c0 = arith.constant 0 : index
    %c0_0 = arith.constant 0 : index
    %0 = vector.load %arg1[%c0, %c0_0] : memref<8x32xf32, #tpu.memory_space<vmem>>, vector<8x32xf32>
    %c0_1 = arith.constant 0 : index
    %c0_2 = arith.constant 0 : index
    %1 = vector.load %arg2[%c0_1, %c0_2] : memref<32x128xf32, #tpu.memory_space<vmem>>, vector<32x128xf32>
    %cst = arith.constant dense<0.000000e+00> : vector<8x128xf32>
    %2 = tpu.matmul %0, %1, %cst {dimension_numbers = #tpu.dot_dimension_numbers<[1], [0], [0], [1], [0, 0, 1, 1], [], []>} : vector<8x32xf32>, vector<32x128xf32>, vector<8x128xf32> -> vector<8x128xf32>
    %c0_3 = arith.constant 0 : index
    %c0_4 = arith.constant 0 : index
    %3 = vector.load %arg3[%c0_3, %c0_4] : memref<1x128xf32, #tpu.memory_space<vmem>>, vector<1x128xf32>
    %4 = vector.broadcast %3 : vector<1x128xf32> to vector<8x128xf32>
    %5 = arith.addf %2, %4 : vector<8x128xf32>
    %cst_5 = arith.constant 0.000000e+00 : f32
    %6 = vector.broadcast %cst_5 : f32 to vector<8x128xf32>
    %7 = arith.maximumf %5, %6 : vector<8x128xf32>
    %c0_6 = arith.constant 0 : index
    %c0_7 = arith.constant 0 : index
    %8 = vector.load %arg4[%c0_6, %c0_7] : memref<128x48xf32, #tpu.memory_space<vmem>>, vector<128x48xf32>
    %cst_8 = arith.constant dense<0.000000e+00> : vector<8x48xf32>
    %9 = tpu.matmul %7, %8, %cst_8 {dimension_numbers = #tpu.dot_dimension_numbers<[1], [0], [0], [1], [0, 0, 1, 1], [], []>} : vector<8x128xf32>, vector<128x48xf32>, vector<8x48xf32> -> vector<8x48xf32>
    %c0_9 = arith.constant 0 : index
    %c0_10 = arith.constant 0 : index
    %10 = vector.load %arg5[%c0_9, %c0_10] : memref<1x48xf32, #tpu.memory_space<vmem>>, vector<1x48xf32>
    %11 = vector.broadcast %10 : vector<1x48xf32> to vector<8x48xf32>
    %12 = arith.addf %9, %11 : vector<8x48xf32>
    %c0_11 = arith.constant 0 : index
    %c0_12 = arith.constant 0 : index
    %13 = vector.load %arg6[%c0_11, %c0_12] : memref<8x48xf32, #tpu.memory_space<vmem>>, vector<8x48xf32>
    tpu.vector_store %arg6[%c0_11, %c0_12], %12 {strides = array<i32>} : memref<8x48xf32, #tpu.memory_space<vmem>>, vector<8x48xf32>,
    return
  }
  func.func @transform_0(%arg0: i32) -> (i32, i32) {
    %c0_i32 = arith.constant 0 : i32
    %c0_i32_0 = arith.constant 0 : i32
    return %arg0, %c0_i32 : i32, i32
  }
  func.func @transform_1(%arg0: i32) -> (i32, i32) {
    %c0_i32 = arith.constant 0 : i32
    %c0_i32_0 = arith.constant 0 : i32
    %c0_i32_1 = arith.constant 0 : i32
    return %c0_i32, %c0_i32_0 : i32, i32
  }
  func.func @transform_2(%arg0: i32) -> (i32, i32) {
    %c0_i32 = arith.constant 0 : i32
    %c0_i32_0 = arith.constant 0 : i32
    %c0_i32_1 = arith.constant 0 : i32
    return %c0_i32, %c0_i32_0 : i32, i32
  }
  func.func @transform_3(%arg0: i32) -> (i32, i32) {
    %c0_i32 = arith.constant 0 : i32
    %c0_i32_0 = arith.constant 0 : i32
    %c0_i32_1 = arith.constant 0 : i32
    return %c0_i32, %c0_i32_0 : i32, i32
  }
  func.func @transform_4(%arg0: i32) -> (i32, i32) {
    %c0_i32 = arith.constant 0 : i32
    %c0_i32_0 = arith.constant 0 : i32
    %c0_i32_1 = arith.constant 0 : i32
    return %c0_i32, %c0_i32_0 : i32, i32
  }
  func.func @transform_5(%arg0: i32) -> (i32, i32) {
    %c0_i32 = arith.constant 0 : i32
    %c0_i32_0 = arith.constant 0 : i32
    return %arg0, %c0_i32 : i32, i32
  }
}

</mosaic_0001>

<bundles_post_ra>
// kernel: tpu_custom_call.1
= control target key start
LH: loop header
LB: loop body
LE: loop exit
PB: predicated region body
PF: predicated region fallthrough
CT: control target
= control target key end

     0   :  { %v313_v1 = vmov 0.0   ;;  %vm314_vm0 = vmmov 0   ;;  %vm33_vm1 = vcmask 261120   ;;  %s442_s0 = inlined_call_operand.vmem [shape: f32[8,32], index: 0, kind: input, shape index: {}]   ;;  %s443_s1 = inlined_call_operand.vmem [shape: f32[32,128], index: 1, kind: input, shape index: {}]   ;;  %s444_s2 = inlined_call_operand.vmem [shape: f32[1,128], index: 2, kind: input, shape index: {}]   ;;  %s445_s3 = inlined_call_operand.vmem [shape: f32[128,48], index: 3, kind: input, shape index: {}]   ;;  %s446_s4 = inlined_call_operand.vmem [shape: f32[1,48], index: 4, kind: input, shape index: {}]   ;;  %s447_s5 = inlined_call_operand.hbm [shape: f32[8,48], index: 5, kind: output, shape index: {}]  }
   0x1   :  { %v25_v0 = vld [vmem:[%s443_s1 + $0x18] sm:$0xff]  ;;  %242 = vmatprep.subr.mxu0 %v313_v1  ;;  %v24_v2 = vld [vmem:[%s443_s1 + $0x10] sm:$0xff]  ;;  %250 = vmatprep.mubr.msk.f32.mxu0 %vm314_vm0, %v313_v1  ;;  %v23_v5 = vld [vmem:[%s443_s1 + $0x8] sm:$0xff] }
   0x2   :  { %v123_v3 = vld [vmem:[%s445_s3 + $0x78] sm:$0xff]  ;;  %243 = vmatpush3.msra.mxu0 %v25_v0  ;;  %253 = vmatprep.subr.mxu1 %v313_v1  ;;  %v122_v4 = vld [vmem:[%s445_s3 + $0x70] sm:$0xff]  ;;  %v121_v6 = vld [vmem:[%s445_s3 + $0x68] sm:$0xff] }
   0x3   :  { %244 = vmatprep.subr.mxu0 %v313_v1  ;;  %254 = vmatpush3.msra.mxu1 %v123_v3  ;;  %v22_v7 = vld [vmem:[%s443_s1] sm:$0xff] }
   0x4   :  { %245 = vmatpush3.msra.mxu0 %v24_v2  ;;  %255 = vmatprep.subr.mxu1 %v313_v1  ;;  %v21_v8 = vld [vmem:[%s442_s0] sm:$0xff] }
   0x5   :  { %246 = vmatprep.subr.mxu0 %v313_v1  ;;  %256 = vmatpush3.msra.mxu1 %v122_v4  ;;  %v120_v9 = vld [vmem:[%s445_s3 + $0x60] sm:$0xff] }
   0x6   :  { %247 = vmatpush3.msra.mxu0 %v23_v5  ;;  %257 = vmatprep.subr.mxu1 %v313_v1 }
   0x7   :  { %10 = vsyncpa [#allocation3], 0  ;;  %248 = vmatprep.subr.mxu0 %v313_v1  ;;  %258 = vmatpush3.msra.mxu1 %v121_v6  ;;  %v119_v10 = vld [vmem:[%s445_s3 + $0x58] sm:$0xff]  ;;  %v118_v11 = vld [vmem:[%s445_s3 + $0x50] sm:$0xff]  ;;  %s315_s11 = smov [#allocation2]   ;;  %vm201_vm2 = vcmask 392192  }
   0x8   :  { %249 = vmatpush3.msra.mxu0 %v22_v7  ;;  %259 = vmatprep.subr.mxu1 %v313_v1  ;;  %v117_v12 = vld [vmem:[%s445_s3 + $0x48] sm:$0xff]  ;;  %v116_v13 = vld [vmem:[%s445_s3 + $0x40] sm:$0xff]  ;;  %v115_v14 = vld [vmem:[%s445_s3 + $0x38] sm:$0xff]  ;;  %s209_s0 = sshll.u32 %s315_s11, 4  ;;  %s210_s0 = int_to_ptr.vmem [resolvable:$true] %s209_s0 }
   0x9   :  { %251 = vmatmul.mubr.msk.f32.vlgmr.msra.gmra.mxu0 %vm33_vm1, %v21_v8  ;;  %260 = vmatpush3.msra.mxu1 %v120_v9  ;;  %v114_v15 = vld [vmem:[%s445_s3 + $0x30] sm:$0xff]  ;;  %v113_v16 = vld [vmem:[%s445_s3 + $0x28] sm:$0xff]  ;;  %v112_v17 = vld [vmem:[%s445_s3 + $0x20] sm:$0xff]  ;;  %p296_p1 = scmp.lt.s32.totalorder %s210_s0, %s210_s0 }
   0xa   :  { %261 = vmatprep.subr.mxu1 %v313_v1  ;;  %285 = vmatprep.mubr.msk.f32.mxu1 %vm314_vm0, %v313_v1  ;;  %v111_v18 = vld [vmem:[%s445_s3 + $0x18] sm:$0xff]  ;;  %v110_v19 = vld [vmem:[%s445_s3 + $0x10] sm:$0xff]  ;;  %v109_v20 = vld [vmem:[%s445_s3 + $0x8] sm:$0xff] }
   0xb   :  { %262 = vmatpush3.msra.mxu1 %v119_v10  ;;  %v108_v21 = vld [vmem:[%s445_s3] sm:$0xff]  ;;  %s291_s3 = scalar_lea.vmem %s210_s0, 128 }
   0xc   :  { %263 = vmatprep.subr.mxu1 %v313_v1  ;;  %v217_v22 = vld [vmem:[%s444_s2] ss:$0 sm:$0xff]  ;;  %p292_p0 = scmp.ne.s32.totalorder %s210_s0, %s291_s3  ;;  %p297_p2 = scmp.lt.s32.totalorder %s291_s3, %s291_s3 }
   0xd   :  { %264 = vmatpush3.msra.mxu1 %v118_v11  ;;  %v219_v27 = vld [vmem:[%s446_s4] ss:$0 sm:$0xff] }
   0xe   :  { %265 = vmatprep.subr.mxu1 %v313_v1  ;;  %p298_p3 = por %p297_p2, %p296_p1 }
   0xf   :  { %266 = vmatpush3.msra.mxu1 %v117_v12 }
  0x10   :  { %267 = vmatprep.subr.mxu1 %v313_v1  ;;  %p299_p4 = pnand %p298_p3, %p292_p0 }
  0x11   :  { %268 = vmatpush3.msra.mxu1 %v116_v13 }
  0x12   :  { %269 = vmatprep.subr.mxu1 %v313_v1 }
  0x13   :  { %270 = vmatpush3.msra.mxu1 %v115_v14 }
  0x14   :  { %271 = vmatprep.subr.mxu1 %v313_v1 }
  0x15   :  { %272 = vmatpush3.msra.mxu1 %v114_v15 }
  0x16   :  { %273 = vmatprep.subr.mxu1 %v313_v1 }
  0x17   :  { %274 = vmatpush3.msra.mxu1 %v113_v16 }
  0x18   :  { %275 = vmatprep.subr.mxu1 %v313_v1 }
  0x19   :  { %276 = vmatpush3.msra.mxu1 %v112_v17 }
  0x1a   :  { %277 = vmatprep.subr.mxu1 %v313_v1 }
  0x1b   :  { %278 = vmatpush3.msra.mxu1 %v111_v18 }
  0x1c   :  { %279 = vmatprep.subr.mxu1 %v313_v1 }
  0x1d   :  { %280 = vmatpush3.msra.mxu1 %v110_v19 }
  0x1e   :  { %281 = vmatprep.subr.mxu1 %v313_v1 }
  0x1f   :  { %282 = vmatpush3.msra.mxu1 %v109_v20 }
  0x20   :  { %283 = vmatprep.subr.mxu1 %v313_v1 }
  0x21   :  { %284 = vmatpush3.msra.mxu1 %v108_v21 }
  0xc9   :  { %v103_v23 = vpop.f32.mrf.mxu0 }
  0xca   :  { %v104_v24 = vadd.f32 %v217_v22, %v103_v23 }
  0xcb   :  { %v252_v25 = vpop.f32.mrf.mxu0 }
  0xcc   :  { %v107_v26 = vmax.f32 %v104_v24, 0.0 }
  0xce   :  { %286 = vmatmul.mubr.f32.vlgmr.msra.gmra.mxu1 %v107_v26 }
 0x18e   :  { %v197_v28 = vpop.f32.mrf.mxu1 }
 0x18f   :  { %v198_v29 = vadd.f32 %v219_v27, %v197_v28 }
 0x190   :  { %v287_v30 = vpop.f32.mrf.mxu1 }
 0x191   :  { %202 = vst.msk [vmem:[#allocation2] sm:$0xff] %vm201_vm2, %v198_v29 }
 0x192   :  { %302 = shalt.err (!%p299_p4)
}
 0x193   :  { %212 = dma.vmem_to_hbm [thread:$0]  %s210_s0, 128, %s447_s5, [#allocation3]  }
 0x194   :  { %311 = dma.done.wait [#allocation3], 128  }
 0x195   :  { %312 = vsyncadd [#allocation3], 4294967168 }
 0x196   :  { %216 = vsyncpa [#allocation3], 1 }

</bundles_post_ra>
